<compile_context>
chip_gen: v6e
topology: v6e:2x2x1
jax: 0.10.0
libtpu: 0.0.40
codegen_flags: <defaults>
</compile_context>

<pallas_src>
import math
import numpy as np
import jax
import jax.numpy as jnp
from jax.experimental import pallas as pl
from jax.experimental.pallas import tpu as pltpu

# ---------------- configuration (consistent with the module) -----------------
IMG_SIZE = 16
PATCH_SIZE = 4
STRIDE = 4
EMBED_DIM = 32
OUT_CHANS = 3
B = 2

PADDING = PATCH_SIZE // 2
H = W = (IMG_SIZE + 2 * PADDING - PATCH_SIZE) // STRIDE + 1      # = 5
N_TOKENS = H * W                                                 # = 25
OUT_FEATURES = PATCH_SIZE * PATCH_SIZE * OUT_CHANS               # = 48
HIN = H * PATCH_SIZE                                             # = 20 (!= 16 -> resample path)
IN_COLS = N_TOKENS * EMBED_DIM                                   # = 800
OUT_COLS = OUT_CHANS * IMG_SIZE * IMG_SIZE                       # = 768 = 6*128 (lane-dense)


# ---------------- PyTorch-exact bicubic interpolation matrix -----------------
def _cubic_conv1(x, A=-0.75):
    return ((A + 2.0) * x - (A + 3.0)) * x * x + 1.0


def _cubic_conv2(x, A=-0.75):
    return ((A * x - 5.0 * A) * x + 8.0 * A) * x - 4.0 * A


def bicubic_matrix(in_size, out_size):
    """(out_size, in_size) numpy f64 matrix reproducing torch Upsample(
    mode='bicubic', align_corners=False) along one axis (A=-0.75,
    border-clamped accumulated weights)."""
    Wm = np.zeros((out_size, in_size), dtype=np.float64)
    scale = in_size / out_size
    for o in range(out_size):
        src = scale * (o + 0.5) - 0.5          # cubic: negative src NOT clamped
        f = math.floor(src)
        t = src - f
        ws = (_cubic_conv2(t + 1.0), _cubic_conv1(t),
              _cubic_conv1(1.0 - t), _cubic_conv2(2.0 - t))
        for k in range(4):
            idx = min(max(f - 1 + k, 0), in_size - 1)
            Wm[o, idx] += ws[k]
    return Wm


# ---------------- fused linear operator (built once at init, numpy) ----------
def build_fused_operator(proj_w, proj_b):
    """proj_w: (F, E) numpy, proj_b: (F,) numpy.
    Returns M (IN_COLS, OUT_COLS) and b_eff (1, OUT_COLS) as f64 numpy such that
    out2d = x2d @ M + b_eff reproduces proj -> rearrange -> bicubic resample."""
    if HIN == IMG_SIZE:
        # PyTorch skips the Upsample entirely in this case -> identity resample.
        wh = np.eye(IMG_SIZE, dtype=np.float64)
        ww = np.eye(IMG_SIZE, dtype=np.float64)
    else:
        wh = bicubic_matrix(HIN, IMG_SIZE)     # (16, 20)
        ww = bicubic_matrix(HIN, IMG_SIZE)     # (16, 20)

    # Wh[i, h*P + q1] -> Wh_r[i, h, q1]; same for Ww along columns.
    wh_r = wh.reshape(IMG_SIZE, H, PATCH_SIZE)
    ww_r = ww.reshape(IMG_SIZE, W, PATCH_SIZE)
    # proj weight, feature axis f = q1*(P*C) + q2*C + c
    wp_r = proj_w.astype(np.float64).reshape(PATCH_SIZE, PATCH_SIZE,
                                             OUT_CHANS, EMBED_DIM)

    # M[(h,w,e), (c,i,j)] = sum_{q1,q2} Wh[i,h*P+q1] * Ww[j,w*P+q2] * W[f(q1,q2,c), e]
    M = np.einsum('ihq,jwr,qrce->hwecij', wh_r, ww_r, wp_r)
    M = M.reshape(IN_COLS, OUT_COLS)

    # bias pushed through rearrange (tiled over h,w) + resample
    zb = np.tile(proj_b.astype(np.float64).reshape(1, PATCH_SIZE, 1, PATCH_SIZE,
                                                   OUT_CHANS),
                 (H, 1, W, 1, 1)).reshape(HIN, HIN, OUT_CHANS)
    b_eff = np.einsum('ir,js,rsc->cij', wh, ww, zb).reshape(1, OUT_COLS)

    return M, b_eff


# ---------------- Pallas kernel (lane-dense output blocks) -------------------
def fused_kernel(x_ref, m_ref, b_ref, o_ref):
    # x: (B, 800) bf16   m: (800, col_blk) bf16   b: (1, col_blk) f32
    # o: (B, col_blk) f32 -- f32 accumulation on the MXU.
    o_ref[...] = (jnp.dot(x_ref[...], m_ref[...],
                          preferred_element_type=jnp.float32) + b_ref[...])


def _num_output_col_blocks():
    """2 lane-dense column blocks on v7x (2 TensorCores/chip), 1 on v5e/v6e."""
    try:
        kind = jax.devices()[0].device_kind.lower()
    except Exception:
        return 1
    return 2 if "v7" in kind else 1


# ---------------- module factory ---------------------------------------------
def make_patch_merging(proj_w, proj_b):
    """Builds the fused constant operator at init time (numpy) and returns a
    jitted forward: x (B, N, E) -> (B, C, IMG_SIZE, IMG_SIZE)."""
    M_np, b_np = build_fused_operator(np.asarray(proj_w), np.asarray(proj_b))
    # bf16 weights: halves the dominant HBM stream; accumulation stays f32.
    M = jnp.asarray(M_np, dtype=jnp.bfloat16)        # (800, 768)  ~1.2 MB
    b_eff = jnp.asarray(b_np, dtype=jnp.float32)      # (1, 768)

    nb = _num_output_col_blocks()
    col_blk = OUT_COLS // nb                           # 768 or 384, both k*128

    cost = pl.CostEstimate(
        flops=2 * B * IN_COLS * OUT_COLS,
        transcendentals=0,
        bytes_accessed=(2 * (B * IN_COLS + IN_COLS * OUT_COLS)     # bf16 x, M
                        + 4 * (OUT_COLS + B * OUT_COLS)),          # f32 b, out
    )

    grid_spec = pltpu.PrefetchScalarGridSpec(
        num_scalar_prefetch=0,
        grid=(nb,),
        in_specs=[
            # x is tiny (3.2 KB bf16); re-fetched per column block, negligible.
            pl.BlockSpec((B, IN_COLS), lambda j: (0, 0)),
            pl.BlockSpec((IN_COLS, col_blk), lambda j: (0, j)),
            pl.BlockSpec((1, col_blk), lambda j: (0, j)),
        ],
        out_specs=pl.BlockSpec((B, col_blk), lambda j: (0, j)),
    )

    call = pl.pallas_call(
        fused_kernel,
        out_shape=jax.ShapeDtypeStruct((B, OUT_COLS), jnp.float32),
        grid_spec=grid_spec,
        compiler_params=pltpu.CompilerParams(
            dimension_semantics=("parallel",)),        # shards across TCs on v7x
        cost_estimate=cost,
    )

    @jax.jit
    def forward(x):
        x2d = x.reshape(B, IN_COLS).astype(jnp.bfloat16)
        out2d = call(x2d, M, b_eff)
        return out2d.reshape(B, OUT_CHANS, IMG_SIZE, IMG_SIZE)

    return forward


# ---------------- step-by-step float64 reference (module semantics) ----------
def reference_forward_np(x, proj_w, proj_b):
    x = np.asarray(x, dtype=np.float64)
    proj_w = np.asarray(proj_w, dtype=np.float64)
    proj_b = np.asarray(proj_b, dtype=np.float64)
    y = x @ proj_w.T + proj_b                                    # (B, N, F)
    y = y.reshape(B, H, W, PATCH_SIZE, PATCH_SIZE, OUT_CHANS)
    y = y.transpose(0, 5, 1, 3, 2, 4).reshape(B, OUT_CHANS, HIN, HIN)
    if HIN == IMG_SIZE:
        return y
    wh = bicubic_matrix(HIN, IMG_SIZE)
    return np.einsum('ir,js,bcrs->bcij', wh, wh, y)


# ---------------- main --------------------------------------------------------
if __name__ == "__main__":
    key = jax.random.PRNGKey(0)
    k1, k2, k3 = jax.random.split(key, 3)

    # nn.Linear(embed_dim, patch_size*patch_size*out_chans) default-style init
    bound = 1.0 / math.sqrt(EMBED_DIM)
    proj_w = jax.random.uniform(k1, (OUT_FEATURES, EMBED_DIM),
                                minval=-bound, maxval=bound, dtype=jnp.float32)
    proj_b = jax.random.uniform(k2, (OUT_FEATURES,),
                                minval=-bound, maxval=bound, dtype=jnp.float32)

    x = jax.random.normal(k3, (B, N_TOKENS, EMBED_DIM), dtype=jnp.float32)

    forward = make_patch_merging(proj_w, proj_b)
    out = jax.block_until_ready(forward(x))
    assert out.shape == (B, OUT_CHANS, IMG_SIZE, IMG_SIZE), out.shape

    ref = reference_forward_np(x, proj_w, proj_b)
    err = float(np.max(np.abs(np.asarray(out, dtype=np.float64) - ref)))
    assert err < 2e-2, f"max abs error too large: {err}"

    print("KERNEL_OK")
</pallas_src>

<mosaic_0001>
module attributes {stable_mosaic.version = 11 : i64} {
  func.func @fused_kernel(%arg0: i32, %arg1: memref<2x800xbf16, #tpu.memory_space<vmem>>, %arg2: memref<800x768xbf16, #tpu.memory_space<vmem>>, %arg3: memref<1x768xf32, #tpu.memory_space<vmem>>, %arg4: memref<2x768xf32, #tpu.memory_space<vmem>>) attributes {dimension_semantics = [#tpu.dimension_semantics<parallel>], iteration_bounds = array<i64: 1>, scalar_prefetch = 0 : i64, scratch_operands = 0 : i64, tpu.core_type = #tpu.core_type<tc>, window_params = [{pipeline_mode = #tpu.pipeline_mode<synchronous>, transform_indices = @transform_0, window_bounds = array<i64: 2, 800>}, {transform_indices = @transform_1, window_bounds = array<i64: 800, 768>}, {transform_indices = @transform_2, window_bounds = array<i64: 1, 768>}, {transform_indices = @transform_3, window_bounds = array<i64: 2, 768>}]} {
    %c0 = arith.constant 0 : index
    %c0_0 = arith.constant 0 : index
    %0 = vector.load %arg1[%c0, %c0_0] : memref<2x800xbf16, #tpu.memory_space<vmem>>, vector<2x800xbf16>
    %c0_1 = arith.constant 0 : index
    %c0_2 = arith.constant 0 : index
    %1 = vector.load %arg2[%c0_1, %c0_2] : memref<800x768xbf16, #tpu.memory_space<vmem>>, vector<800x768xbf16>
    %cst = arith.constant dense<0.000000e+00> : vector<2x768xf32>
    %2 = tpu.matmul %0, %1, %cst {dimension_numbers = #tpu.dot_dimension_numbers<[1], [0], [0], [1], [0, 0, 1, 1], [], []>} : vector<2x800xbf16>, vector<800x768xbf16>, vector<2x768xf32> -> vector<2x768xf32>
    %c0_3 = arith.constant 0 : index
    %c0_4 = arith.constant 0 : index
    %3 = vector.load %arg3[%c0_3, %c0_4] : memref<1x768xf32, #tpu.memory_space<vmem>>, vector<1x768xf32>
    %4 = vector.broadcast %3 : vector<1x768xf32> to vector<2x768xf32>
    %5 = arith.addf %2, %4 : vector<2x768xf32>
    %c0_5 = arith.constant 0 : index
    %c0_6 = arith.constant 0 : index
    %6 = vector.load %arg4[%c0_5, %c0_6] : memref<2x768xf32, #tpu.memory_space<vmem>>, vector<2x768xf32>
    tpu.vector_store %arg4[%c0_5, %c0_6], %5 {strides = array<i32>} : memref<2x768xf32, #tpu.memory_space<vmem>>, vector<2x768xf32>,
    return
  }
  func.func @transform_0(%arg0: i32) -> (i32, i32) {
    %c0_i32 = arith.constant 0 : i32
    %c0_i32_0 = arith.constant 0 : i32
    %c0_i32_1 = arith.constant 0 : i32
    return %c0_i32, %c0_i32_0 : i32, i32
  }
  func.func @transform_1(%arg0: i32) -> (i32, i32) {
    %c0_i32 = arith.constant 0 : i32
    %c0_i32_0 = arith.constant 0 : i32
    return %c0_i32, %arg0 : i32, i32
  }
  func.func @transform_2(%arg0: i32) -> (i32, i32) {
    %c0_i32 = arith.constant 0 : i32
    %c0_i32_0 = arith.constant 0 : i32
    return %c0_i32, %arg0 : i32, i32
  }
  func.func @transform_3(%arg0: i32) -> (i32, i32) {
    %c0_i32 = arith.constant 0 : i32
    %c0_i32_0 = arith.constant 0 : i32
    return %c0_i32, %arg0 : i32, i32
  }
}

</mosaic_0001>

<bundles_post_ra>
// kernel: forward.1
= control target key start
LH: loop header
LB: loop body
LE: loop exit
PB: predicated region body
PF: predicated region fallthrough
CT: control target
= control target key end

     0   :  { %8 = vsyncpa [#allocation3], 0  ;;  %s3399_s0 = inlined_call_operand.vmem [shape: bf16[2,800], index: 0, kind: input, shape index: {}]   ;;  %s3400_s1 = inlined_call_operand.hbm [shape: bf16[800,768], index: 1, kind: input, shape index: {}]   ;;  %s3401_s2 = inlined_call_operand.hbm [shape: f32[1,768], index: 2, kind: input, shape index: {}]   ;;  %s3402_s3 = inlined_call_operand.vmem [shape: f32[2,768], index: 3, kind: output, shape index: {}]  }
   0x1   :  { %9 = vsyncpa [#allocation5], 0  ;;  %s3272_s12 = smov [#allocation2]  }
   0x2   :  { %s17_s13 = sshll.u32 %s3272_s12, 4  ;;  %s18_s13 = int_to_ptr.vmem [resolvable:$true] %s17_s13 }
   0x3   :  { %s3236_s14 = scalar_lea.vmem %s18_s13, 38400  ;;  %p3241_p1 = scmp.lt.s32.totalorder %s18_s13, %s18_s13 }
   0x4   :  { %p3237_p0 = scmp.ne.s32.totalorder %s18_s13, %s3236_s14  ;;  %p3242_p2 = scmp.lt.s32.totalorder %s3236_s14, %s3236_s14 }
   0x6   :  { %p3243_p3 = por %p3242_p2, %p3241_p1 }
   0x8   :  { %p3244_p4 = pnand %p3243_p3, %p3237_p0 }
   0xa   :  { %3247 = shalt.err (!%p3244_p4)
}
   0xb   :  { %s3273_s15 = smov 384   ;;  %s3274_s16 = smov 24  }
   0xc   :  { %23 = dma.hbm_to_vmem [thread:$0]  %s3400_s1, 38400, %s18_s13, [#allocation3], %s3273_s15, %s3273_s15, %s3274_s16  }
   0xd   :  { %s3275_s19 = smov [#allocation4]  }
   0xe   :  { %s30_s20 = sshll.u32 %s3275_s19, 4  ;;  %s31_s20 = int_to_ptr.vmem [resolvable:$true] %s30_s20 }
   0xf   :  { %s3256_s21 = scalar_lea.vmem %s31_s20, 96  ;;  %p3261_p6 = scmp.lt.s32.totalorder %s31_s20, %s31_s20 }
  0x10   :  { %p3257_p5 = scmp.ne.s32.totalorder %s31_s20, %s3256_s21  ;;  %p3262_p7 = scmp.lt.s32.totalorder %s3256_s21, %s3256_s21 }
  0x12   :  { %p3263_p8 = por %p3262_p7, %p3261_p6 }
  0x14   :  { %p3264_p9 = pnand %p3263_p8, %p3257_p5 }
  0x16   :  { %3267 = shalt.err (!%p3264_p9)
}
  0x17   :  { %33 = dma.hbm_to_vmem [thread:$0]  %s3401_s2, 96, %s31_s20, [#allocation5]  }
  0x18   :  { %3268 = dma.done.wait [#allocation3], 38400  }
  0x19   :  { %3269 = vsyncadd [#allocation3], 4294928896 }
  0x1a   :  { %3270 = dma.done.wait [#allocation5], 96  }
  0x1b   :  { %3271 = vsyncadd [#allocation5], 4294967200  ;;  %v2777_v0 = vld [vmem:[#allocation2 + $0x154] ss:$24 sps:$4 sm:$0xff]   ;;  %v2781_v2 = vld [vmem:[#allocation2 + $0x150] ss:$24 sps:$4 sm:$0xff]   ;;  %v344_v36 = vlaneseq }
  0x1c   :  { %v2779_v1 = vld [vmem:[#allocation2 + $0x454] ss:$24 sps:$4 sm:$0xff]   ;;  %1933 = vmatprep.subr.bf16.mxu0 %v2777_v0  ;;  %v2782_v3 = vld [vmem:[#allocation2 + $0x450] ss:$24 sps:$4 sm:$0xff]   ;;  %v2783_v4 = vld [vmem:[#allocation2 + $0x124] ss:$24 sps:$4 sm:$0xff]  }
  0x1d   :  { %1974 = vmatprep.subr.bf16.mxu1 %v2779_v1  ;;  %1934 = vmatpush1.bf16.msra.mxu0 %v2781_v2  ;;  %v2785_v5 = vld [vmem:[#allocation2 + $0x424] ss:$24 sps:$4 sm:$0xff]   ;;  %v2787_v6 = vld [vmem:[#allocation2 + $0x120] ss:$24 sps:$4 sm:$0xff]   ;;  %v2789_v8 = vld [vmem:[#allocation2 + $0xf4] ss:$24 sps:$4 sm:$0xff]  }
  0x1e   :  { %1975 = vmatpush1.bf16.msra.mxu1 %v2782_v3  ;;  %1935 = vmatprep.subr.bf16.mxu0 %v2783_v4  ;;  %v2788_v7 = vld [vmem:[#allocation2 + $0x420] ss:$24 sps:$4 sm:$0xff]   ;;  %v2791_v9 = vld [vmem:[#allocation2 + $0x3f4] ss:$24 sps:$4 sm:$0xff]   ;;  %v2793_v10 = vld [vmem:[#allocation2 + $0xf0] ss:$24 sps:$4 sm:$0xff]  }
  0x1f   :  { %1976 = vmatprep.subr.bf16.mxu1 %v2785_v5  ;;  %v2794_v11 = vld [vmem:[#allocation2 + $0x3f0] ss:$24 sps:$4 sm:$0xff]   ;;  %v2795_v12 = vld [vmem:[#allocation2 + $0xc4] ss:$24 sps:$4 sm:$0xff]   ;;  %v2799_v14 = vld [vmem:[#allocation2 + $0xc0] ss:$24 sps:$4 sm:$0xff]  }
  0x20   :  { %v2797_v13 = vld [vmem:[#allocation2 + $0x3c4] ss:$24 sps:$4 sm:$0xff]   ;;  %v2800_v15 = vld [vmem:[#allocation2 + $0x3c0] ss:$24 sps:$4 sm:$0xff]   ;;  %v2801_v16 = vld [vmem:[#allocation2 + $0x94] ss:$24 sps:$4 sm:$0xff]  }
  0x21   :  { %1936 = vmatpush1.bf16.msra.mxu0 %v2787_v6  ;;  %v2803_v17 = vld [vmem:[#allocation2 + $0x394] ss:$24 sps:$4 sm:$0xff]   ;;  %v2805_v18 = vld [vmem:[#allocation2 + $0x90] ss:$24 sps:$4 sm:$0xff]   ;;  %v2807_v20 = vld [vmem:[#allocation2 + $0x64] ss:$24 sps:$4 sm:$0xff]  }
  0x22   :  { %1977 = vmatpush1.bf16.msra.mxu1 %v2788_v7  ;;  %1937 = vmatprep.subr.bf16.mxu0 %v2789_v8  ;;  %v2806_v19 = vld [vmem:[#allocation2 + $0x390] ss:$24 sps:$4 sm:$0xff]   ;;  %v2809_v21 = vld [vmem:[#allocation2 + $0x364] ss:$24 sps:$4 sm:$0xff]   ;;  %v2811_v22 = vld [vmem:[#allocation2 + $0x60] ss:$24 sps:$4 sm:$0xff]  }
  0x23   :  { %1978 = vmatprep.subr.bf16.mxu1 %v2791_v9  ;;  %v2812_v23 = vld [vmem:[#allocation2 + $0x360] ss:$24 sps:$4 sm:$0xff]   ;;  %v2813_v24 = vld [vmem:[#allocation2 + $0x34] ss:$24 sps:$4 sm:$0xff]   ;;  %v2817_v26 = vld [vmem:[#allocation2 + $0x30] ss:$24 sps:$4 sm:$0xff]  }
  0x24   :  { %v2815_v25 = vld [vmem:[#allocation2 + $0x334] ss:$24 sps:$4 sm:$0xff]   ;;  %v2818_v27 = vld [vmem:[#allocation2 + $0x330] ss:$24 sps:$4 sm:$0xff]   ;;  %v2819_v28 = vld [vmem:[#allocation2 + $0x4] ss:$24 sps:$4 sm:$0xff]  }
  0x25   :  { %1938 = vmatpush1.bf16.msra.mxu0 %v2793_v10  ;;  %v2821_v29 = vld [vmem:[#allocation2 + $0x304] ss:$24 sps:$4 sm:$0xff]   ;;  %v2823_v30 = vld [vmem:[#allocation2] ss:$24 sps:$4 sm:$0xff]   ;;  %v2825_v32 = vld [vmem:[#allocation2 + $0x2d4] ss:$24 sps:$4 sm:$0xff]  }
  0x26   :  { %1979 = vmatpush1.bf16.msra.mxu1 %v2794_v11  ;;  %1939 = vmatprep.subr.bf16.mxu0 %v2795_v12  ;;  %v2824_v31 = vld [vmem:[#allocation2 + $0x300] ss:$24 sps:$4 sm:$0xff]   ;;  %v2827_v33 = vld [vmem:[#allocation2 + $0x5d4] ss:$24 sps:$4 sm:$0xff]   ;;  %v2829_v34 = vld [vmem:[#allocation2 + $0x2d0] ss:$24 sps:$4 sm:$0xff]  }
  0x27   :  { %1980 = vmatprep.subr.bf16.mxu1 %v2797_v13  ;;  %v2830_v35 = vld [vmem:[#allocation2 + $0x5d0] ss:$24 sps:$4 sm:$0xff]   ;;  %v3276_v37 = vmov 1966171168   ;;  %v2831_v39 = vld [vmem:[#allocation2 + $0x2a4] ss:$24 sps:$4 sm:$0xff]  }
  0x28   :  { %v377_v38 = vunpack.c.l.s4 %v3276_v37  ;;  %v2833_v40 = vld [vmem:[#allocation2 + $0x5a4] ss:$24 sps:$4 sm:$0xff]   ;;  %v2835_v41 = vld [vmem:[#allocation2 + $0x2a0] ss:$24 sps:$4 sm:$0xff]   ;;  %v3305_v42 = vshrl.u32 %v344_v36, 7  ;;  %vm1929_vm0 = vcmask 261120  }
  0x29   :  { %1940 = vmatpush1.bf16.msra.mxu0 %v2799_v14  ;;  %v2836_v44 = vld [vmem:[#allocation2 + $0x5a0] ss:$24 sps:$4 sm:$0xff]   ;;  %v2837_v45 = vld [vmem:[#allocation2 + $0x274] ss:$24 sps:$4 sm:$0xff]   ;;  %v2841_v47 = vld [vmem:[#allocation2 + $0x270] ss:$24 sps:$4 sm:$0xff]  }
  0x2a   :  { %1981 = vmatpush1.bf16.msra.mxu1 %v2800_v15  ;;  %1941 = vmatprep.subr.bf16.mxu0 %v2801_v16  ;;  %v378_v43 = vunpack.c.0.s8 %v377_v38  ;;  %v2839_v46 = vld [vmem:[#allocation2 + $0x574] ss:$24 sps:$4 sm:$0xff]   ;;  %v2842_v48 = vld [vmem:[#allocation2 + $0x570] ss:$24 sps:$4 sm:$0xff]   ;;  %v2843_v50 = vld [vmem:[#allocation2 + $0x244] ss:$24 sps:$4 sm:$0xff]  }
  0x2b   :  { %1982 = vmatprep.subr.bf16.mxu1 %v2803_v17  ;;  %v2845_v51 = vld [vmem:[#allocation2 + $0x544] ss:$24 sps:$4 sm:$0xff]   ;;  %v2847_v53 = vld [vmem:[#allocation2 + $0x240] ss:$24 sps:$4 sm:$0xff]   ;;  %v2849_v56 = vld [vmem:[#allocation2 + $0x214] ss:$24 sps:$4 sm:$0xff]  }
  0x2c   :  { %v3308_v49 = vsub.s32 %v378_v43, %v3305_v42  ;;  %v41_v52 = vld [vmem:[%s3399_s0] sm:$0x7f]  ;;  %v2851_v57 = vld [vmem:[#allocation2 + $0x514] ss:$24 sps:$4 sm:$0xff]   ;;  %v2853_v59 = vld [vmem:[#allocation2 + $0x210] ss:$24 sps:$4 sm:$0xff]  }
  0x2d   :  { %1942 = vmatpush1.bf16.msra.mxu0 %v2805_v18  ;;  %v2848_v55 = vld [vmem:[#allocation2 + $0x540] ss:$24 sps:$4 sm:$0xff]   ;;  %v2854_v61 = vld [vmem:[#allocation2 + $0x510] ss:$24 sps:$4 sm:$0xff]   ;;  %v2855_v62 = vld [vmem:[#allocation2 + $0x1e4] ss:$24 sps:$4 sm:$0xff]   ;;  %v375_v7 = vcombine.high %v41_v52, %v41_v52 }
  0x2e   :  { %1983 = vmatpush1.bf16.msra.mxu1 %v2806_v19  ;;  %1943 = vmatprep.subr.bf16.mxu0 %v2807_v20  ;;  %v382_v54 = vrot.slane %v41_v52, %v3308_v49  ;;  %v2857_v63 = vld [vmem:[#allocation2 + $0x4e4] ss:$24 sps:$4 sm:$0xff]   ;;  %v2859_v1 = vld [vmem:[#allocation2 + $0x1e0] ss:$24 sps:$4 sm:$0xff]   ;;  %v2861_v3 = vld [vmem:[#allocation2 + $0x1b4] ss:$24 sps:$4 sm:$0xff]  }
  0x2f   :  { %1984 = vmatprep.subr.bf16.mxu1 %v2809_v21  ;;  %v2860_v2 = vld [vmem:[#allocation2 + $0x4e0] ss:$24 sps:$4 sm:$0xff]   ;;  %v2863_v4 = vld [vmem:[#allocation2 + $0x4b4] ss:$24 sps:$4 sm:$0xff]   ;;  %v2865_v5 = vld [vmem:[#allocation2 + $0x1b0] ss:$24 sps:$4 sm:$0xff]   ;;  %v389_v13 = vrot.slane %v375_v7, %v3308_v49 }
  0x30   :  { %v390_v58 = vcombine.high %v382_v54, %v382_v54  ;;  %v2866_v6 = vld [vmem:[#allocation2 + $0x4b0] ss:$24 sps:$4 sm:$0xff]   ;;  %v2867_v8 = vld [vmem:[#allocation2 + $0x184] ss:$24 sps:$4 sm:$0xff]   ;;  %v2871_v10 = vld [vmem:[#allocation2 + $0x180] ss:$24 sps:$4 sm:$0xff]   ;;  %v3324_v11 = vrot.slane %v382_v54, %v3308_v49 }
  0x31   :  { %1944 = vmatpush1.bf16.msra.mxu0 %v2811_v22  ;;  %v2869_v9 = vld [vmem:[#allocation2 + $0x484] ss:$24 sps:$4 sm:$0xff]   ;;  %v2872_v12 = vld [vmem:[#allocation2 + $0x480] ss:$24 sps:$4 sm:$0xff]   ;;  %v2876_v14 = vld [vmem:[#allocation2 + $0x754] ss:$24 sps:$4 sm:$0xff]   ;;  %v391_v16 = vcombine.high %v389_v13, %v389_v13 }
  0x32   :  { %1985 = vmatpush1.bf16.msra.mxu1 %v2812_v23  ;;  %1945 = vmatprep.subr.bf16.mxu0 %v2813_v24  ;;  %v3315_v60 = vrot.slane %v390_v58, %v3308_v49  ;;  %v2879_v15 = vld [vmem:[#allocation2 + $0x934] ss:$24 sps:$4 sm:$0xff]   ;;  %v2874_v17 = vld [vmem:[#allocation2 + $0x750] ss:$24 sps:$4 sm:$0xff]   ;;  %v3329_v18 = vcombine.high %v3324_v11, %v3324_v11  ;;  %v2882_v20 = vld [vmem:[#allocation2 + $0x724] ss:$24 sps:$4 sm:$0xff]   ;;  %v3335_v23 = vrot.slane %v389_v13, %v3308_v49 }
  0x33   :  { %1986 = vmatprep.subr.bf16.mxu1 %v2815_v25  ;;  %v2877_v19 = vld [vmem:[#allocation2 + $0x930] ss:$24 sps:$4 sm:$0xff]   ;;  %v2885_v21 = vld [vmem:[#allocation2 + $0x904] ss:$24 sps:$4 sm:$0xff]   ;;  %v3332_v22 = vrot.slane %v391_v16, %v3308_v49  ;;  %v2880_v24 = vld [vmem:[#allocation2 + $0x720] ss:$24 sps:$4 sm:$0xff]  }
  0x34   :  { %v3319_v0 = vcombine.high %v3315_v60, %v3315_v60  ;;  %1965 = vmatprep.mubr.bf16.mxu0 %v3315_v60  ;;  %v2883_v25 = vld [vmem:[#allocation2 + $0x900] ss:$24 sps:$4 sm:$0xff]   ;;  %v2900_v36 = vld [vmem:[#allocation2 + $0x694] ss:$24 sps:$4 sm:$0xff]   ;;  %v2898_v38 = vld [vmem:[#allocation2 + $0x690] ss:$24 sps:$4 sm:$0xff]  }
  0x35   :  { %1946 = vmatpush1.bf16.msra.mxu0 %v2817_v26  ;;  %v2888_v26 = vld [vmem:[#allocation2 + $0x6f4] ss:$24 sps:$4 sm:$0xff]   ;;  %v2904_v43 = vld [vmem:[#allocation2 + $0x660] ss:$24 sps:$4 sm:$0xff]   ;;  %v2918_v49 = vld [vmem:[#allocation2 + $0x604] ss:$24 sps:$4 sm:$0xff]  }
  0x36   :  { %1987 = vmatpush1.bf16.msra.mxu1 %v2818_v27  ;;  %1947 = vmatprep.subr.bf16.mxu0 %v2819_v28  ;;  %v2891_v27 = vld [vmem:[#allocation2 + $0x15c] ss:$24 sps:$4 sm:$0xff]   ;;  %v3277_v28 = vmov 0   ;;  %v2919_v52 = vld [vmem:[#allocation2 + $0x68] ss:$24 sps:$4 sm:$0xff]  }
  0x37   :  { %1988 = vmatprep.subr.bf16.mxu1 %v2821_v29  ;;  %2006 = vmatprep.mubr.bf16.mxu1 %v3319_v0  ;;  %v2886_v29 = vld [vmem:[#allocation2 + $0x6f0] ss:$24 sps:$4 sm:$0xff]   ;;  %v2903_v37 = vld [vmem:[#allocation2 + $0xfc] ss:$24 sps:$4 sm:$0xff]   ;;  %v2933_v58 = vld [vmem:[#allocation2 + $0xc] ss:$24 sps:$4 sm:$0xff]  }
  0x38   :  { %v2927_v54 = vld [vmem:[#allocation2 + $0x3c] ss:$24 sps:$4 sm:$0xff]   ;;  %v2957_v13 = vld [vmem:[#allocation2 + $0x24c] ss:$24 sps:$4 sm:$0xff]  }
  0x39   :  { %1948 = vmatpush1.bf16.msra.mxu0 %v2823_v30  ;;  %v3343_v30 = vcombine.high %v3335_v23, %v3335_v23  ;;  %v2948_v7 = vld [vmem:[#allocation2 + $0x814] ss:$24 sps:$4 sm:$0xff]  }
  0x3a   :  { %1989 = vmatpush1.bf16.msra.mxu1 %v2824_v31  ;;  %1949 = vmatprep.subr.bf16.mxu0 %v2825_v32  ;;  %v2889_v31 = vld [vmem:[#allocation2 + $0x158] ss:$24 sps:$4 sm:$0xff]   ;;  %v2894_v32 = vld [vmem:[#allocation2 + $0x6c4] ss:$24 sps:$4 sm:$0xff]   ;;  %v2960_v16 = vld [vmem:[#allocation2 + $0x7b4] ss:$24 sps:$4 sm:$0xff]  }
  0x3b   :  { %1990 = vmatprep.subr.bf16.mxu1 %v2827_v33  ;;  %v2897_v33 = vld [vmem:[#allocation2 + $0x12c] ss:$24 sps:$4 sm:$0xff]  }
  0x3d   :  { %1950 = vmatpush2.bf16.msra.mxu0 %v2829_v34  ;;  %v2892_v34 = vld [vmem:[#allocation2 + $0x6c0] ss:$24 sps:$4 sm:$0xff]  }
  0x3e   :  { %1991 = vmatpush2.bf16.msra.mxu1 %v2830_v35  ;;  %1951 = vmatprep.subr.bf16.mxu0 %v2831_v39  ;;  %v2895_v35 = vld [vmem:[#allocation2 + $0x128] ss:$24 sps:$4 sm:$0xff]   ;;  %v2901_v39 = vld [vmem:[#allocation2 + $0xf8] ss:$24 sps:$4 sm:$0xff]  }
  0x3f   :  { %1992 = vmatprep.subr.bf16.mxu1 %v2833_v40  ;;  %v2906_v40 = vld [vmem:[#allocation2 + $0x664] ss:$24 sps:$4 sm:$0xff]  }
  0x41   :  { %1952 = vmatpush2.bf16.msra.mxu0 %v2835_v41  ;;  %v2909_v41 = vld [vmem:[#allocation2 + $0xcc] ss:$24 sps:$4 sm:$0xff]  }
  0x42   :  { %1993 = vmatpush2.bf16.msra.mxu1 %v2836_v44  ;;  %1953 = vmatprep.subr.bf16.mxu0 %v2837_v45  ;;  %v2907_v44 = vld [vmem:[#allocation2 + $0xc8] ss:$24 sps:$4 sm:$0xff]   ;;  %v2912_v45 = vld [vmem:[#allocation2 + $0x634] ss:$24 sps:$4 sm:$0xff]  }
  0x43   :  { %1994 = vmatprep.subr.bf16.mxu1 %v2839_v46  ;;  %v2915_v46 = vld [vmem:[#allocation2 + $0x9c] ss:$24 sps:$4 sm:$0xff]  }
  0x45   :  { %1954 = vmatpush2.bf16.msra.mxu0 %v2841_v47  ;;  %v2910_v47 = vld [vmem:[#allocation2 + $0x630] ss:$24 sps:$4 sm:$0xff]  }
  0x46   :  { %1995 = vmatpush2.bf16.msra.mxu1 %v2842_v48  ;;  %1955 = vmatprep.subr.bf16.mxu0 %v2843_v50  ;;  %v2913_v48 = vld [vmem:[#allocation2 + $0x98] ss:$24 sps:$4 sm:$0xff]   ;;  %v2921_v50 = vld [vmem:[#allocation2 + $0x6c] ss:$24 sps:$4 sm:$0xff]  }
  0x47   :  { %1996 = vmatprep.subr.bf16.mxu1 %v2845_v51  ;;  %v2916_v51 = vld [vmem:[#allocation2 + $0x600] ss:$24 sps:$4 sm:$0xff]  }
  0x49   :  { %1956 = vmatpush2.bf16.msra.mxu0 %v2847_v53  ;;  %v2924_v53 = vld [vmem:[#allocation2 + $0x8d4] ss:$24 sps:$4 sm:$0xff]  }
  0x4a   :  { %1997 = vmatpush2.bf16.msra.mxu1 %v2848_v55  ;;  %1957 = vmatprep.subr.bf16.mxu0 %v2849_v56  ;;  %v2922_v55 = vld [vmem:[#allocation2 + $0x8d0] ss:$24 sps:$4 sm:$0xff]  }
  0x4b   :  { %1998 = vmatprep.subr.bf16.mxu1 %v2851_v57  ;;  %v2925_v56 = vld [vmem:[#allocation2 + $0x38] ss:$24 sps:$4 sm:$0xff]   ;;  %v2930_v57 = vld [vmem:[#allocation2 + $0x8a4] ss:$24 sps:$4 sm:$0xff]  }
  0x4d   :  { %1958 = vmatpush2.bf16.msra.mxu0 %v2853_v59  ;;  %v2928_v59 = vld [vmem:[#allocation2 + $0x8a0] ss:$24 sps:$4 sm:$0xff]  }
  0x4e   :  { %1999 = vmatpush2.bf16.msra.mxu1 %v2854_v61  ;;  %1959 = vmatprep.subr.bf16.mxu0 %v2855_v62  ;;  %v2931_v61 = vld [vmem:[#allocation2 + $0x8] ss:$24 sps:$4 sm:$0xff]   ;;  %v2936_v62 = vld [vmem:[#allocation2 + $0x874] ss:$24 sps:$4 sm:$0xff]  }
  0x4f   :  { %2000 = vmatprep.subr.bf16.mxu1 %v2857_v63  ;;  %v2939_v63 = vld [vmem:[#allocation2 + $0x2dc] ss:$24 sps:$4 sm:$0xff]  }
  0x51   :  { %1960 = vmatpush2.bf16.msra.mxu0 %v2859_v1  ;;  %v2934_v1 = vld [vmem:[#allocation2 + $0x870] ss:$24 sps:$4 sm:$0xff]  }
  0x52   :  { %2001 = vmatpush2.bf16.msra.mxu1 %v2860_v2  ;;  %1961 = vmatprep.subr.bf16.mxu0 %v2861_v3  ;;  %v2937_v2 = vld [vmem:[#allocation2 + $0x2d8] ss:$24 sps:$4 sm:$0xff]   ;;  %v2942_v3 = vld [vmem:[#allocation2 + $0x844] ss:$24 sps:$4 sm:$0xff]  }
  0x53   :  { %2002 = vmatprep.subr.bf16.mxu1 %v2863_v4  ;;  %v2945_v4 = vld [vmem:[#allocation2 + $0x2ac] ss:$24 sps:$4 sm:$0xff]  }
  0x55   :  { %1962 = vmatpush2.bf16.msra.mxu0 %v2865_v5  ;;  %v2940_v5 = vld [vmem:[#allocation2 + $0x840] ss:$24 sps:$4 sm:$0xff]  }
  0x56   :  { %2003 = vmatpush2.bf16.msra.mxu1 %v2866_v6  ;;  %1963 = vmatprep.subr.bf16.mxu0 %v2867_v8  ;;  %v2943_v6 = vld [vmem:[#allocation2 + $0x2a8] ss:$24 sps:$4 sm:$0xff]   ;;  %v2951_v8 = vld [vmem:[#allocation2 + $0x27c] ss:$24 sps:$4 sm:$0xff]  }
  0x57   :  { %2004 = vmatprep.subr.bf16.mxu1 %v2869_v9  ;;  %v2946_v9 = vld [vmem:[#allocation2 + $0x810] ss:$24 sps:$4 sm:$0xff]  }
  0x59   :  { %1964 = vmatpush2.bf16.msra.mxu0 %v2871_v10  ;;  %v2949_v10 = vld [vmem:[#allocation2 + $0x278] ss:$24 sps:$4 sm:$0xff]  }
  0x5a   :  { %2005 = vmatpush2.bf16.msra.mxu1 %v2872_v12  ;;  %2015 = vmatprep.subr.bf16.mxu0 %v2876_v14  ;;  %v2954_v12 = vld [vmem:[#allocation2 + $0x7e4] ss:$24 sps:$4 sm:$0xff]   ;;  %v2952_v14 = vld [vmem:[#allocation2 + $0x7e0] ss:$24 sps:$4 sm:$0xff]  }
  0x5b   :  { %2068 = vmatprep.subr.bf16.mxu1 %v2879_v15  ;;  %v2955_v15 = vld [vmem:[#allocation2 + $0x248] ss:$24 sps:$4 sm:$0xff]  }
  0x5c   :  { %1966 = vmatmul.mubr.bf16.vlgmr.msra.gmra.mxu0 %v3324_v11 }
  0x5d   :  { %2007 = vmatmul.mubr.bf16.vlgmr.msra.gmra.mxu1 %v3329_v18  ;;  %2016 = vmatpush1.bf16.msra.mxu0 %v2874_v17  ;;  %v2963_v17 = vld [vmem:[#allocation2 + $0x21c] ss:$24 sps:$4 sm:$0xff]  }
  0x5e   :  { %2069 = vmatpush1.bf16.msra.mxu1 %v2877_v19  ;;  %2017 = vmatprep.subr.bf16.mxu0 %v2882_v20  ;;  %v2958_v19 = vld [vmem:[#allocation2 + $0x7b0] ss:$24 sps:$4 sm:$0xff]  }
  0x5f   :  { %2070 = vmatprep.subr.bf16.mxu1 %v2885_v21  ;;  %2088 = vmatprep.mubr.bf16.mxu1 %v3277_v28  ;;  %v2961_v20 = vld [vmem:[#allocation2 + $0x218] ss:$24 sps:$4 sm:$0xff]   ;;  %v2966_v21 = vld [vmem:[#allocation2 + $0x784] ss:$24 sps:$4 sm:$0xff]  }
  0x60   :  { %2047 = vmatprep.mubr.bf16.mxu0 %v3332_v22 }
  0x61   :  { %2018 = vmatpush1.bf16.msra.mxu0 %v2880_v24  ;;  %v2969_v24 = vld [vmem:[#allocation2 + $0x1ec] ss:$24 sps:$4 sm:$0xff]  }
  0x62   :  { %2071 = vmatpush1.bf16.msra.mxu1 %v2883_v25  ;;  %2019 = vmatprep.subr.bf16.mxu0 %v2888_v26  ;;  %v2964_v25 = vld [vmem:[#allocation2 + $0x780] ss:$24 sps:$4 sm:$0xff]  }
  0x63   :  { %2097 = vmatprep.subr.bf16.mxu1 %v2891_v27  ;;  %v2967_v26 = vld [vmem:[#allocation2 + $0x1e8] ss:$24 sps:$4 sm:$0xff]   ;;  %v2972_v27 = vld [vmem:[#allocation2 + $0x1bc] ss:$24 sps:$4 sm:$0xff]  }
  0x65   :  { %2766 = vmatmul.mubr.msk.bf16.vlgmr.msra.gmra.mxu1 %vm1929_vm0, %v3343_v30  ;;  %2020 = vmatpush1.bf16.msra.mxu0 %v2886_v29  ;;  %v2975_v29 = vld [vmem:[#allocation2 + $0x45c] ss:$24 sps:$4 sm:$0xff]  }
  0x66   :  { %2098 = vmatpush1.bf16.msra.mxu1 %v2889_v31  ;;  %2021 = vmatprep.subr.bf16.mxu0 %v2894_v32  ;;  %v2970_v31 = vld [vmem:[#allocation2 + $0x1b8] ss:$24 sps:$4 sm:$0xff]  }
  0x67   :  { %2099 = vmatprep.subr.bf16.mxu1 %v2897_v33  ;;  %2129 = vmatprep.mubr.bf16.mxu1 %v3315_v60  ;;  %v2973_v32 = vld [vmem:[#allocation2 + $0x458] ss:$24 sps:$4 sm:$0xff]   ;;  %v2978_v33 = vld [vmem:[#allocation2 + $0x18c] ss:$24 sps:$4 sm:$0xff]  }
  0x69   :  { %2022 = vmatpush1.bf16.msra.mxu0 %v2892_v34  ;;  %v2981_v34 = vld [vmem:[#allocation2 + $0x42c] ss:$24 sps:$4 sm:$0xff]  }
  0x6a   :  { %2100 = vmatpush1.bf16.msra.mxu1 %v2895_v35  ;;  %2023 = vmatprep.subr.bf16.mxu0 %v2900_v36  ;;  %v2976_v35 = vld [vmem:[#allocation2 + $0x188] ss:$24 sps:$4 sm:$0xff]  }
  0x6b   :  { %2101 = vmatprep.subr.bf16.mxu1 %v2903_v37  ;;  %v2979_v36 = vld [vmem:[#allocation2 + $0x428] ss:$24 sps:$4 sm:$0xff]   ;;  %v2984_v37 = vld [vmem:[#allocation2 + $0x3fc] ss:$24 sps:$4 sm:$0xff]  }
  0x6d   :  { %2024 = vmatpush1.bf16.msra.mxu0 %v2898_v38  ;;  %v2987_v38 = vld [vmem:[#allocation2 + $0x75c] ss:$24 sps:$4 sm:$0xff]  }
  0x6e   :  { %2102 = vmatpush1.bf16.msra.mxu1 %v2901_v39  ;;  %2025 = vmatprep.subr.bf16.mxu0 %v2906_v40  ;;  %v2982_v39 = vld [vmem:[#allocation2 + $0x3f8] ss:$24 sps:$4 sm:$0xff]  }
  0x6f   :  { %2103 = vmatprep.subr.bf16.mxu1 %v2909_v41  ;;  %v2985_v40 = vld [vmem:[#allocation2 + $0x758] ss:$24 sps:$4 sm:$0xff]   ;;  %v2990_v41 = vld [vmem:[#allocation2 + $0x3cc] ss:$24 sps:$4 sm:$0xff]  }
  0x71   :  { %2026 = vmatpush1.bf16.msra.mxu0 %v2904_v43  ;;  %v2993_v43 = vld [vmem:[#allocation2 + $0x72c] ss:$24 sps:$4 sm:$0xff]  }
  0x72   :  { %2104 = vmatpush1.bf16.msra.mxu1 %v2907_v44  ;;  %2027 = vmatprep.subr.bf16.mxu0 %v2912_v45  ;;  %v2988_v44 = vld [vmem:[#allocation2 + $0x3c8] ss:$24 sps:$4 sm:$0xff]  }
  0x73   :  { %2105 = vmatprep.subr.bf16.mxu1 %v2915_v46  ;;  %v2991_v45 = vld [vmem:[#allocation2 + $0x728] ss:$24 sps:$4 sm:$0xff]   ;;  %v2996_v46 = vld [vmem:[#allocation2 + $0x39c] ss:$24 sps:$4 sm:$0xff]  }
  0x75   :  { %2028 = vmatpush1.bf16.msra.mxu0 %v2910_v47  ;;  %v2999_v47 = vld [vmem:[#allocation2 + $0x6fc] ss:$24 sps:$4 sm:$0xff]  }
  0x76   :  { %2106 = vmatpush1.bf16.msra.mxu1 %v2913_v48  ;;  %2029 = vmatprep.subr.bf16.mxu0 %v2918_v49  ;;  %v2994_v48 = vld [vmem:[#allocation2 + $0x398] ss:$24 sps:$4 sm:$0xff]  }
  0x77   :  { %2107 = vmatprep.subr.bf16.mxu1 %v2921_v50  ;;  %v2997_v49 = vld [vmem:[#allocation2 + $0x6f8] ss:$24 sps:$4 sm:$0xff]   ;;  %v3002_v50 = vld [vmem:[#allocation2 + $0x36c] ss:$24 sps:$4 sm:$0xff]  }
  0x79   :  { %2030 = vmatpush1.bf16.msra.mxu0 %v2916_v51  ;;  %v3005_v51 = vld [vmem:[#allocation2 + $0x6cc] ss:$24 sps:$4 sm:$0xff]  }
  0x7a   :  { %2108 = vmatpush1.bf16.msra.mxu1 %v2919_v52  ;;  %2031 = vmatprep.subr.bf16.mxu0 %v2924_v53  ;;  %v3000_v52 = vld [vmem:[#allocation2 + $0x368] ss:$24 sps:$4 sm:$0xff]  }
  0x7b   :  { %2109 = vmatprep.subr.bf16.mxu1 %v2927_v54  ;;  %v3003_v53 = vld [vmem:[#allocation2 + $0x6c8] ss:$24 sps:$4 sm:$0xff]   ;;  %v3008_v54 = vld [vmem:[#allocation2 + $0x33c] ss:$24 sps:$4 sm:$0xff]  }
  0x7d   :  { %2032 = vmatpush2.bf16.msra.mxu0 %v2922_v55  ;;  %v3011_v55 = vld [vmem:[#allocation2 + $0x69c] ss:$24 sps:$4 sm:$0xff]  }
  0x7e   :  { %2110 = vmatpush1.bf16.msra.mxu1 %v2925_v56  ;;  %2033 = vmatprep.subr.bf16.mxu0 %v2930_v57  ;;  %v3006_v56 = vld [vmem:[#allocation2 + $0x338] ss:$24 sps:$4 sm:$0xff]  }
  0x7f   :  { %2111 = vmatprep.subr.bf16.mxu1 %v2933_v58  ;;  %v3009_v57 = vld [vmem:[#allocation2 + $0x698] ss:$24 sps:$4 sm:$0xff]   ;;  %v3014_v58 = vld [vmem:[#allocation2 + $0x30c] ss:$24 sps:$4 sm:$0xff]  }
  0x81   :  { %2034 = vmatpush2.bf16.msra.mxu0 %v2928_v59  ;;  %v3017_v59 = vld [vmem:[#allocation2 + $0x66c] ss:$24 sps:$4 sm:$0xff]  }
  0x82   :  { %2112 = vmatpush1.bf16.msra.mxu1 %v2931_v61  ;;  %2035 = vmatprep.subr.bf16.mxu0 %v2936_v62  ;;  %v3012_v61 = vld [vmem:[#allocation2 + $0x308] ss:$24 sps:$4 sm:$0xff]  }
  0x83   :  { %2113 = vmatprep.subr.bf16.mxu1 %v2939_v63  ;;  %v3015_v62 = vld [vmem:[#allocation2 + $0x668] ss:$24 sps:$4 sm:$0xff]   ;;  %v3020_v63 = vld [vmem:[#allocation2 + $0x5dc] ss:$24 sps:$4 sm:$0xff]  }
  0x85   :  { %2036 = vmatpush2.bf16.msra.mxu0 %v2934_v1  ;;  %v3023_v1 = vld [vmem:[#allocation2 + $0x63c] ss:$24 sps:$4 sm:$0xff]  }
  0x86   :  { %2114 = vmatpush2.bf16.msra.mxu1 %v2937_v2  ;;  %2037 = vmatprep.subr.bf16.mxu0 %v2942_v3  ;;  %v3018_v2 = vld [vmem:[#allocation2 + $0x5d8] ss:$24 sps:$4 sm:$0xff]  }
  0x87   :  { %2115 = vmatprep.subr.bf16.mxu1 %v2945_v4  ;;  %v3021_v3 = vld [vmem:[#allocation2 + $0x638] ss:$24 sps:$4 sm:$0xff]   ;;  %v3026_v4 = vld [vmem:[#allocation2 + $0x5ac] ss:$24 sps:$4 sm:$0xff]  }
  0x89   :  { %2038 = vmatpush2.bf16.msra.mxu0 %v2940_v5  ;;  %v3029_v5 = vld [vmem:[#allocation2 + $0x60c] ss:$24 sps:$4 sm:$0xff]  }
  0x8a   :  { %2116 = vmatpush2.bf16.msra.mxu1 %v2943_v6  ;;  %2039 = vmatprep.subr.bf16.mxu0 %v2948_v7  ;;  %v3024_v6 = vld [vmem:[#allocation2 + $0x5a8] ss:$24 sps:$4 sm:$0xff]  }
  0x8b   :  { %2117 = vmatprep.subr.bf16.mxu1 %v2951_v8  ;;  %v3027_v7 = vld [vmem:[#allocation2 + $0x608] ss:$24 sps:$4 sm:$0xff]   ;;  %v3032_v8 = vld [vmem:[#allocation2 + $0x57c] ss:$24 sps:$4 sm:$0xff]  }
  0x8d   :  { %2040 = vmatpush2.bf16.msra.mxu0 %v2946_v9  ;;  %v3035_v9 = vld [vmem:[#allocation2 + $0x8dc] ss:$24 sps:$4 sm:$0xff]  }
  0x8e   :  { %2118 = vmatpush2.bf16.msra.mxu1 %v2949_v10  ;;  %2041 = vmatprep.subr.bf16.mxu0 %v2954_v12  ;;  %v3030_v10 = vld [vmem:[#allocation2 + $0x578] ss:$24 sps:$4 sm:$0xff]  }
  0x8f   :  { %2119 = vmatprep.subr.bf16.mxu1 %v2957_v13  ;;  %v3033_v12 = vld [vmem:[#allocation2 + $0x8d8] ss:$24 sps:$4 sm:$0xff]   ;;  %v3038_v13 = vld [vmem:[#allocation2 + $0x54c] ss:$24 sps:$4 sm:$0xff]  }
  0x91   :  { %2042 = vmatpush2.bf16.msra.mxu0 %v2952_v14  ;;  %v3041_v14 = vld [vmem:[#allocation2 + $0x8ac] ss:$24 sps:$4 sm:$0xff]  }
  0x92   :  { %2120 = vmatpush2.bf16.msra.mxu1 %v2955_v15  ;;  %2043 = vmatprep.subr.bf16.mxu0 %v2960_v16  ;;  %v3036_v15 = vld [vmem:[#allocation2 + $0x548] ss:$24 sps:$4 sm:$0xff]  }
  0x93   :  { %2121 = vmatprep.subr.bf16.mxu1 %v2963_v17  ;;  %v3039_v16 = vld [vmem:[#allocation2 + $0x8a8] ss:$24 sps:$4 sm:$0xff]   ;;  %v3044_v17 = vld [vmem:[#allocation2 + $0x51c] ss:$24 sps:$4 sm:$0xff]  }
  0x95   :  { %2044 = vmatpush2.bf16.msra.mxu0 %v2958_v19  ;;  %v3047_v19 = vld [vmem:[#allocation2 + $0x87c] ss:$24 sps:$4 sm:$0xff]  }
  0x96   :  { %2122 = vmatpush2.bf16.msra.mxu1 %v2961_v20  ;;  %2045 = vmatprep.subr.bf16.mxu0 %v2966_v21  ;;  %v3042_v20 = vld [vmem:[#allocation2 + $0x518] ss:$24 sps:$4 sm:$0xff]  }
  0x97   :  { %2123 = vmatprep.subr.bf16.mxu1 %v2969_v24  ;;  %v3045_v21 = vld [vmem:[#allocation2 + $0x878] ss:$24 sps:$4 sm:$0xff]   ;;  %v3050_v24 = vld [vmem:[#allocation2 + $0x4ec] ss:$24 sps:$4 sm:$0xff]  }
  0x99   :  { %2046 = vmatpush2.bf16.msra.mxu0 %v2964_v25  ;;  %v3053_v25 = vld [vmem:[#allocation2 + $0x84c] ss:$24 sps:$4 sm:$0xff]  }
  0x9a   :  { %2124 = vmatpush2.bf16.msra.mxu1 %v2967_v26  ;;  %2138 = vmatprep.subr.bf16.mxu0 %v2975_v29  ;;  %v3048_v26 = vld [vmem:[#allocation2 + $0x4e8] ss:$24 sps:$4 sm:$0xff]   ;;  %v3056_v29 = vld [vmem:[#allocation2 + $0x4bc] ss:$24 sps:$4 sm:$0xff]  }
  0x9b   :  { %2125 = vmatprep.subr.bf16.mxu1 %v2972_v27  ;;  %v3051_v27 = vld [vmem:[#allocation2 + $0x848] ss:$24 sps:$4 sm:$0xff]  }
  0x9c   :  { %2048 = vmatmul.mubr.bf16.vlgmr.msra.gmra.mxu0 %v3335_v23 }
  0x9d   :  { %2139 = vmatpush1.bf16.msra.mxu0 %v2973_v32  ;;  %2170 = vmatprep.mubr.bf16.mxu0 %v3319_v0  ;;  %v3054_v32 = vld [vmem:[#allocation2 + $0x4b8] ss:$24 sps:$4 sm:$0xff]  }
  0x9e   :  { %2126 = vmatpush2.bf16.msra.mxu1 %v2970_v31  ;;  %2140 = vmatprep.subr.bf16.mxu0 %v2981_v34  ;;  %v3059_v31 = vld [vmem:[#allocation2 + $0x81c] ss:$24 sps:$4 sm:$0xff]   ;;  %v3062_v34 = vld [vmem:[#allocation2 + $0x48c] ss:$24 sps:$4 sm:$0xff]  }
  0x9f   :  { %2127 = vmatprep.subr.bf16.mxu1 %v2978_v33  ;;  %v3057_v33 = vld [vmem:[#allocation2 + $0x818] ss:$24 sps:$4 sm:$0xff]  }
  0xa1   :  { %2141 = vmatpush1.bf16.msra.mxu0 %v2979_v36  ;;  %v3060_v36 = vld [vmem:[#allocation2 + $0x488] ss:$24 sps:$4 sm:$0xff]  }
  0xa2   :  { %2128 = vmatpush2.bf16.msra.mxu1 %v2976_v35  ;;  %2142 = vmatprep.subr.bf16.mxu0 %v2984_v37  ;;  %v3065_v35 = vld [vmem:[#allocation2 + $0x7ec] ss:$24 sps:$4 sm:$0xff]   ;;  %v3063_v37 = vld [vmem:[#allocation2 + $0x7e8] ss:$24 sps:$4 sm:$0xff]  }
  0xa3   :  { %2179 = vmatprep.subr.bf16.mxu1 %v2987_v38  ;;  %v3068_v38 = vld [vmem:[#allocation2 + $0x7bc] ss:$24 sps:$4 sm:$0xff]  }
  0xa5   :  { %2130 = vmatmul.mubr.bf16.vlgmr.msra.gmra.mxu1 %v3324_v11  ;;  %2143 = vmatpush1.bf16.msra.mxu0 %v2982_v39  ;;  %v3071_v39 = vld [vmem:[#allocation2 + $0x164] ss:$24 sps:$4 sm:$0xff]  }
  0xa6   :  { %2180 = vmatpush1.bf16.msra.mxu1 %v2985_v40  ;;  %2144 = vmatprep.subr.bf16.mxu0 %v2990_v41  ;;  %v3066_v40 = vld [vmem:[#allocation2 + $0x7b8] ss:$24 sps:$4 sm:$0xff]  }
  0xa7   :  { %2181 = vmatprep.subr.bf16.mxu1 %v2993_v43  ;;  %2211 = vmatprep.mubr.bf16.mxu1 %v3332_v22  ;;  %v3069_v41 = vld [vmem:[#allocation2 + $0x160] ss:$24 sps:$4 sm:$0xff]   ;;  %v3074_v43 = vld [vmem:[#allocation2 + $0x78c] ss:$24 sps:$4 sm:$0xff]  }
  0xa9   :  { %2145 = vmatpush1.bf16.msra.mxu0 %v2988_v44  ;;  %v3077_v44 = vld [vmem:[#allocation2 + $0x134] ss:$24 sps:$4 sm:$0xff]  }
  0xaa   :  { %2182 = vmatpush1.bf16.msra.mxu1 %v2991_v45  ;;  %2146 = vmatprep.subr.bf16.mxu0 %v2996_v46  ;;  %v3072_v45 = vld [vmem:[#allocation2 + $0x788] ss:$24 sps:$4 sm:$0xff]  }
  0xab   :  { %2183 = vmatprep.subr.bf16.mxu1 %v2999_v47  ;;  %v3075_v46 = vld [vmem:[#allocation2 + $0x130] ss:$24 sps:$4 sm:$0xff]   ;;  %v3080_v47 = vld [vmem:[#allocation2 + $0x93c] ss:$24 sps:$4 sm:$0xff]  }
  0xad   :  { %2147 = vmatpush1.bf16.msra.mxu0 %v2994_v48  ;;  %v3083_v48 = vld [vmem:[#allocation2 + $0x104] ss:$24 sps:$4 sm:$0xff]  }
  0xae   :  { %2184 = vmatpush1.bf16.msra.mxu1 %v2997_v49  ;;  %2148 = vmatprep.subr.bf16.mxu0 %v3002_v50  ;;  %v3078_v49 = vld [vmem:[#allocation2 + $0x938] ss:$24 sps:$4 sm:$0xff]  }
  0xaf   :  { %2185 = vmatprep.subr.bf16.mxu1 %v3005_v51  ;;  %v3081_v50 = vld [vmem:[#allocation2 + $0x100] ss:$24 sps:$4 sm:$0xff]   ;;  %v3086_v51 = vld [vmem:[#allocation2 + $0x90c] ss:$24 sps:$4 sm:$0xff]  }
  0xb1   :  { %2149 = vmatpush1.bf16.msra.mxu0 %v3000_v52  ;;  %v3089_v52 = vld [vmem:[#allocation2 + $0xd4] ss:$24 sps:$4 sm:$0xff]  }
  0xb2   :  { %2186 = vmatpush1.bf16.msra.mxu1 %v3003_v53  ;;  %2150 = vmatprep.subr.bf16.mxu0 %v3008_v54  ;;  %v3084_v53 = vld [vmem:[#allocation2 + $0x908] ss:$24 sps:$4 sm:$0xff]  }
  0xb3   :  { %2187 = vmatprep.subr.bf16.mxu1 %v3011_v55  ;;  %v3087_v54 = vld [vmem:[#allocation2 + $0xd0] ss:$24 sps:$4 sm:$0xff]   ;;  %v3092_v55 = vld [vmem:[#allocation2 + $0xa4] ss:$24 sps:$4 sm:$0xff]  }
  0xb5   :  { %2151 = vmatpush1.bf16.msra.mxu0 %v3006_v56  ;;  %v3095_v56 = vld [vmem:[#allocation2 + $0x464] ss:$24 sps:$4 sm:$0xff]  }
  0xb6   :  { %2188 = vmatpush1.bf16.msra.mxu1 %v3009_v57  ;;  %2152 = vmatprep.subr.bf16.mxu0 %v3014_v58  ;;  %v3093_v57 = vld [vmem:[#allocation2 + $0x460] ss:$24 sps:$4 sm:$0xff]   ;;  %v3098_v58 = vld [vmem:[#allocation2 + $0x74] ss:$24 sps:$4 sm:$0xff]  }
  0xb7   :  { %2189 = vmatprep.subr.bf16.mxu1 %v3017_v59  ;;  %v3101_v59 = vld [vmem:[#allocation2 + $0x434] ss:$24 sps:$4 sm:$0xff]  }
  0xb9   :  { %2153 = vmatpush1.bf16.msra.mxu0 %v3012_v61  ;;  %v3096_v61 = vld [vmem:[#allocation2 + $0x70] ss:$24 sps:$4 sm:$0xff]  }
  0xba   :  { %2190 = vmatpush1.bf16.msra.mxu1 %v3015_v62  ;;  %2154 = vmatprep.subr.bf16.mxu0 %v3020_v63  ;;  %v3099_v62 = vld [vmem:[#allocation2 + $0x430] ss:$24 sps:$4 sm:$0xff]   ;;  %v3104_v63 = vld [vmem:[#allocation2 + $0x44] ss:$24 sps:$4 sm:$0xff]  }
  0xbb   :  { %2191 = vmatprep.subr.bf16.mxu1 %v3023_v1  ;;  %v3107_v1 = vld [vmem:[#allocation2 + $0x404] ss:$24 sps:$4 sm:$0xff]  }
  0xbd   :  { %2155 = vmatpush2.bf16.msra.mxu0 %v3018_v2  ;;  %v3102_v2 = vld [vmem:[#allocation2 + $0x40] ss:$24 sps:$4 sm:$0xff]  }
  0xbe   :  { %2192 = vmatpush1.bf16.msra.mxu1 %v3021_v3  ;;  %2156 = vmatprep.subr.bf16.mxu0 %v3026_v4  ;;  %v3105_v3 = vld [vmem:[#allocation2 + $0x400] ss:$24 sps:$4 sm:$0xff]   ;;  %v3110_v4 = vld [vmem:[#allocation2 + $0x14] ss:$24 sps:$4 sm:$0xff]  }
  0xbf   :  { %2193 = vmatprep.subr.bf16.mxu1 %v3029_v5  ;;  %v3113_v5 = vld [vmem:[#allocation2 + $0x3d4] ss:$24 sps:$4 sm:$0xff]  }
  0xc1   :  { %2157 = vmatpush2.bf16.msra.mxu0 %v3024_v6  ;;  %v3108_v6 = vld [vmem:[#allocation2 + $0x10] ss:$24 sps:$4 sm:$0xff]  }
  0xc2   :  { %2194 = vmatpush1.bf16.msra.mxu1 %v3027_v7  ;;  %2158 = vmatprep.subr.bf16.mxu0 %v3032_v8  ;;  %v3111_v7 = vld [vmem:[#allocation2 + $0x3d0] ss:$24 sps:$4 sm:$0xff]   ;;  %v3116_v8 = vld [vmem:[#allocation2 + $0x2e4] ss:$24 sps:$4 sm:$0xff]  }
  0xc3   :  { %2195 = vmatprep.subr.bf16.mxu1 %v3035_v9  ;;  %v3119_v9 = vld [vmem:[#allocation2 + $0x3a4] ss:$24 sps:$4 sm:$0xff]  }
  0xc5   :  { %2159 = vmatpush2.bf16.msra.mxu0 %v3030_v10  ;;  %v3114_v10 = vld [vmem:[#allocation2 + $0x2e0] ss:$24 sps:$4 sm:$0xff]  }
  0xc6   :  { %2196 = vmatpush2.bf16.msra.mxu1 %v3033_v12  ;;  %2160 = vmatprep.subr.bf16.mxu0 %v3038_v13  ;;  %v3122_v12 = vld [vmem:[#allocation2 + $0x2b4] ss:$24 sps:$4 sm:$0xff]  }
  0xc7   :  { %2197 = vmatprep.subr.bf16.mxu1 %v3041_v14  ;;  %v3125_v13 = vld [vmem:[#allocation2 + $0x374] ss:$24 sps:$4 sm:$0xff]   ;;  %v3120_v14 = vld [vmem:[#allocation2 + $0x2b0] ss:$24 sps:$4 sm:$0xff]  }
  0xc9   :  { %2161 = vmatpush2.bf16.msra.mxu0 %v3036_v15  ;;  %v3123_v15 = vld [vmem:[#allocation2 + $0x370] ss:$24 sps:$4 sm:$0xff]  }
  0xca   :  { %2198 = vmatpush2.bf16.msra.mxu1 %v3039_v16  ;;  %2162 = vmatprep.subr.bf16.mxu0 %v3044_v17  ;;  %v3128_v16 = vld [vmem:[#allocation2 + $0x284] ss:$24 sps:$4 sm:$0xff]  }
  0xcb   :  { %2199 = vmatprep.subr.bf16.mxu1 %v3047_v19  ;;  %v3131_v17 = vld [vmem:[#allocation2 + $0x344] ss:$24 sps:$4 sm:$0xff]   ;;  %v3126_v19 = vld [vmem:[#allocation2 + $0x280] ss:$24 sps:$4 sm:$0xff]  }
  0xcd   :  { %2163 = vmatpush2.bf16.msra.mxu0 %v3042_v20  ;;  %v3129_v20 = vld [vmem:[#allocation2 + $0x340] ss:$24 sps:$4 sm:$0xff]  }
  0xce   :  { %2200 = vmatpush2.bf16.msra.mxu1 %v3045_v21  ;;  %2164 = vmatprep.subr.bf16.mxu0 %v3050_v24  ;;  %v3134_v21 = vld [vmem:[#allocation2 + $0x254] ss:$24 sps:$4 sm:$0xff]  }
  0xcf   :  { %2201 = vmatprep.subr.bf16.mxu1 %v3053_v25  ;;  %v3137_v24 = vld [vmem:[#allocation2 + $0x314] ss:$24 sps:$4 sm:$0xff]   ;;  %v3132_v25 = vld [vmem:[#allocation2 + $0x250] ss:$24 sps:$4 sm:$0xff]  }
  0xd1   :  { %2165 = vmatpush2.bf16.msra.mxu0 %v3048_v26  ;;  %v3135_v26 = vld [vmem:[#allocation2 + $0x310] ss:$24 sps:$4 sm:$0xff]  }
  0xd2   :  { %2202 = vmatpush2.bf16.msra.mxu1 %v3051_v27  ;;  %2166 = vmatprep.subr.bf16.mxu0 %v3056_v29  ;;  %v3140_v27 = vld [vmem:[#allocation2 + $0x224] ss:$24 sps:$4 sm:$0xff]  }
  0xd3   :  { %2203 = vmatprep.subr.bf16.mxu1 %v3059_v31  ;;  %v3143_v29 = vld [vmem:[#allocation2 + $0x5e4] ss:$24 sps:$4 sm:$0xff]   ;;  %v3138_v31 = vld [vmem:[#allocation2 + $0x220] ss:$24 sps:$4 sm:$0xff]  }
  0xd5   :  { %2167 = vmatpush2.bf16.msra.mxu0 %v3054_v32  ;;  %v3141_v32 = vld [vmem:[#allocation2 + $0x5e0] ss:$24 sps:$4 sm:$0xff]  }
  0xd6   :  { %2204 = vmatpush2.bf16.msra.mxu1 %v3057_v33  ;;  %2168 = vmatprep.subr.bf16.mxu0 %v3062_v34  ;;  %v3146_v33 = vld [vmem:[#allocation2 + $0x1f4] ss:$24 sps:$4 sm:$0xff]  }
  0xd7   :  { %2205 = vmatprep.subr.bf16.mxu1 %v3065_v35  ;;  %v3149_v34 = vld [vmem:[#allocation2 + $0x5b4] ss:$24 sps:$4 sm:$0xff]   ;;  %v3144_v35 = vld [vmem:[#allocation2 + $0x1f0] ss:$24 sps:$4 sm:$0xff]  }
  0xd9   :  { %2169 = vmatpush2.bf16.msra.mxu0 %v3060_v36  ;;  %v3147_v36 = vld [vmem:[#allocation2 + $0x5b0] ss:$24 sps:$4 sm:$0xff]  }
  0xda   :  { %2206 = vmatpush2.bf16.msra.mxu1 %v3063_v37  ;;  %2261 = vmatprep.subr.bf16.mxu0 %v3071_v39  ;;  %v3152_v37 = vld [vmem:[#allocation2 + $0x1c4] ss:$24 sps:$4 sm:$0xff]   ;;  %v3150_v39 = vld [vmem:[#allocation2 + $0x1c0] ss:$24 sps:$4 sm:$0xff]  }
  0xdb   :  { %2207 = vmatprep.subr.bf16.mxu1 %v3068_v38  ;;  %v3155_v38 = vld [vmem:[#allocation2 + $0x584] ss:$24 sps:$4 sm:$0xff]  }
  0xdc   :  { %2171 = vmatmul.mubr.bf16.vlgmr.msra.gmra.mxu0 %v3329_v18 }
  0xdd   :  { %2262 = vmatpush1.bf16.msra.mxu0 %v3069_v41  ;;  %2293 = vmatprep.mubr.bf16.mxu0 %v3315_v60  ;;  %v3090_v60 = vld [vmem:[#allocation2 + $0xa0] ss:$24 sps:$4 sm:$0xff]   ;;  %v3158_v41 = vld [vmem:[#allocation2 + $0x194] ss:$24 sps:$4 sm:$0xff]  }
  0xde   :  { %2208 = vmatpush2.bf16.msra.mxu1 %v3066_v40  ;;  %2263 = vmatprep.subr.bf16.mxu0 %v3077_v44  ;;  %v3153_v40 = vld [vmem:[#allocation2 + $0x580] ss:$24 sps:$4 sm:$0xff]   ;;  %v3156_v44 = vld [vmem:[#allocation2 + $0x190] ss:$24 sps:$4 sm:$0xff]  }
  0xdf   :  { %2209 = vmatprep.subr.bf16.mxu1 %v3074_v43  ;;  %v3161_v43 = vld [vmem:[#allocation2 + $0x554] ss:$24 sps:$4 sm:$0xff]  }
  0xe1   :  { %2264 = vmatpush1.bf16.msra.mxu0 %v3075_v46  ;;  %v346_v46 = vsub.s32 0, %v3305_v42 }
  0xe2   :  { %2210 = vmatpush2.bf16.msra.mxu1 %v3072_v45  ;;  %2265 = vmatprep.subr.bf16.mxu0 %v3083_v48  ;;  %v3159_v45 = vld [vmem:[#allocation2 + $0x550] ss:$24 sps:$4 sm:$0xff]   ;;  %v3164_v48 = vld [vmem:[#allocation2 + $0x524] ss:$24 sps:$4 sm:$0xff]  }
  0xe3   :  { %2232 = vmatprep.subr.bf16.mxu1 %v3080_v47  ;;  %v3360_v47 = vld [vmem:[#allocation4] sm:$0x3f] }
  0xe5   :  { %2212 = vmatmul.mubr.bf16.vlgmr.msra.gmra.mxu1 %v3335_v23  ;;  %2266 = vmatpush1.bf16.msra.mxu0 %v3081_v50  ;;  %v350_v50 = vsub.s32 1, %v3305_v42 }
  0xe6   :  { %2233 = vmatpush1.bf16.msra.mxu1 %v3078_v49  ;;  %2267 = vmatprep.subr.bf16.mxu0 %v3089_v52  ;;  %v3167_v49 = vld [vmem:[#allocation2 + $0x764] ss:$24 sps:$4 sm:$0xff]   ;;  %v3162_v52 = vld [vmem:[#allocation2 + $0x520] ss:$24 sps:$4 sm:$0xff]  }
  0xe7   :  { %2234 = vmatprep.subr.bf16.mxu1 %v3086_v51  ;;  %2252 = vmatprep.mubr.bf16.mxu1 %v3277_v28  ;;  %v347_v51 = vrot.slane %v3360_v47, %v346_v46  ;;  %v3219_v46 = vld [vmem:[#allocation2 + $0x7c0] ss:$24 sps:$4 sm:$0xff]  }
  0xe9   :  { %2268 = vmatpush1.bf16.msra.mxu0 %v3087_v54  ;;  %v3170_v54 = vld [vmem:[#allocation2 + $0x4f4] ss:$24 sps:$4 sm:$0xff]  }
  0xea   :  { %2235 = vmatpush1.bf16.msra.mxu1 %v3084_v53  ;;  %2269 = vmatprep.subr.bf16.mxu0 %v3092_v55  ;;  %v3165_v53 = vld [vmem:[#allocation2 + $0x760] ss:$24 sps:$4 sm:$0xff]   ;;  %v3173_v55 = vld [vmem:[#allocation2 + $0x734] ss:$24 sps:$4 sm:$0xff]  }
  0xeb   :  { %2302 = vmatprep.subr.bf16.mxu1 %v3095_v56  ;;  %v351_v56 = vrot.slane %v3360_v47, %v350_v50 }
  0xed   :  { %2767 = vmatmul.mubr.msk.bf16.vlgmr.msra.gmra.mxu1 %vm1929_vm0, %v3343_v30  ;;  %2270 = vmatpush1.bf16.msra.mxu0 %v3090_v60 }
  0xee   :  { %2303 = vmatpush1.bf16.msra.mxu1 %v3093_v57  ;;  %2271 = vmatprep.subr.bf16.mxu0 %v3098_v58 }
  0xef   :  { %2304 = vmatprep.subr.bf16.mxu1 %v3101_v59  ;;  %2334 = vmatprep.mubr.bf16.mxu1 %v3319_v0  ;;  %v3117_v0 = vld [vmem:[#allocation2 + $0x3a0] ss:$24 sps:$4 sm:$0xff]   ;;  %v3168_v59 = vld [vmem:[#allocation2 + $0x4f0] ss:$24 sps:$4 sm:$0xff]  }
  0xf1   :  { %2272 = vmatpush1.bf16.msra.mxu0 %v3096_v61  ;;  %v3171_v61 = vld [vmem:[#allocation2 + $0x730] ss:$24 sps:$4 sm:$0xff]  }
  0xf2   :  { %2305 = vmatpush1.bf16.msra.mxu1 %v3099_v62  ;;  %2273 = vmatprep.subr.bf16.mxu0 %v3104_v63 }
  0xf3   :  { %2306 = vmatprep.subr.bf16.mxu1 %v3107_v1  ;;  %v3176_v1 = vld [vmem:[#allocation2 + $0x4c4] ss:$24 sps:$4 sm:$0xff]  }
  0xf5   :  { %2274 = vmatpush1.bf16.msra.mxu0 %v3102_v2  ;;  %v3179_v2 = vld [vmem:[#allocation2 + $0x704] ss:$24 sps:$4 sm:$0xff]  }
  0xf6   :  { %2307 = vmatpush1.bf16.msra.mxu1 %v3105_v3  ;;  %2275 = vmatprep.subr.bf16.mxu0 %v3110_v4 }
  0xf7   :  { %2308 = vmatprep.subr.bf16.mxu1 %v3113_v5 }
  0xf9   :  { %2276 = vmatpush1.bf16.msra.mxu0 %v3108_v6 }
  0xfa   :  { %2309 = vmatpush1.bf16.msra.mxu1 %v3111_v7  ;;  %2277 = vmatprep.subr.bf16.mxu0 %v3116_v8  ;;  %v3174_v7 = vld [vmem:[#allocation2 + $0x4c0] ss:$24 sps:$4 sm:$0xff]  }
  0xfb   :  { %2310 = vmatprep.subr.bf16.mxu1 %v3119_v9  ;;  %v3177_v8 = vld [vmem:[#allocation2 + $0x700] ss:$24 sps:$4 sm:$0xff]  }
  0xfd   :  { %2278 = vmatpush2.bf16.msra.mxu0 %v3114_v10  ;;  %v3182_v10 = vld [vmem:[#allocation2 + $0x494] ss:$24 sps:$4 sm:$0xff]  }
  0xfe   :  { %2311 = vmatpush1.bf16.msra.mxu1 %v3117_v0  ;;  %2279 = vmatprep.subr.bf16.mxu0 %v3122_v12  ;;  %v3185_v0 = vld [vmem:[#allocation2 + $0x6d4] ss:$24 sps:$4 sm:$0xff]  }
  0xff   :  { %2312 = vmatprep.subr.bf16.mxu1 %v3125_v13 }
 0x101   :  { %2280 = vmatpush2.bf16.msra.mxu0 %v3120_v14  ;;  %v3180_v14 = vld [vmem:[#allocation2 + $0x490] ss:$24 sps:$4 sm:$0xff]  }
 0x102   :  { %2313 = vmatpush1.bf16.msra.mxu1 %v3123_v15  ;;  %2281 = vmatprep.subr.bf16.mxu0 %v3128_v16  ;;  %v3188_v15 = vld [vmem:[#allocation2 + $0x6a4] ss:$24 sps:$4 sm:$0xff]  }
 0x103   :  { %2314 = vmatprep.subr.bf16.mxu1 %v3131_v17  ;;  %v3218_v17 = vld [vmem:[#allocation2 + $0x944] ss:$24 sps:$4 sm:$0xff]  }
 0x105   :  { %2282 = vmatpush2.bf16.msra.mxu0 %v3126_v19 }
 0x106   :  { %2315 = vmatpush1.bf16.msra.mxu1 %v3129_v20  ;;  %2283 = vmatprep.subr.bf16.mxu0 %v3134_v21  ;;  %v3186_v20 = vld [vmem:[#allocation2 + $0x6a0] ss:$24 sps:$4 sm:$0xff]  }
 0x107   :  { %2316 = vmatprep.subr.bf16.mxu1 %v3137_v24  ;;  %v3216_v21 = vld [vmem:[#allocation2 + $0x940] ss:$24 sps:$4 sm:$0xff]   ;;  %v3191_v24 = vld [vmem:[#allocation2 + $0x674] ss:$24 sps:$4 sm:$0xff]  }
 0x109   :  { %2284 = vmatpush2.bf16.msra.mxu0 %v3132_v25 }
 0x10a   :  { %2317 = vmatpush1.bf16.msra.mxu1 %v3135_v26  ;;  %2285 = vmatprep.subr.bf16.mxu0 %v3140_v27  ;;  %v3224_v26 = vld [vmem:[#allocation2 + $0x914] ss:$24 sps:$4 sm:$0xff]   ;;  %v3189_v27 = vld [vmem:[#allocation2 + $0x670] ss:$24 sps:$4 sm:$0xff]  }
 0x10b   :  { %2318 = vmatprep.subr.bf16.mxu1 %v3143_v29  ;;  %v3222_v29 = vld [vmem:[#allocation2 + $0x910] ss:$24 sps:$4 sm:$0xff]  }
 0x10d   :  { %2286 = vmatpush2.bf16.msra.mxu0 %v3138_v31  ;;  %v3194_v31 = vld [vmem:[#allocation2 + $0x644] ss:$24 sps:$4 sm:$0xff]  }
 0x10e   :  { %2319 = vmatpush2.bf16.msra.mxu1 %v3141_v32  ;;  %2287 = vmatprep.subr.bf16.mxu0 %v3146_v33  ;;  %v3192_v32 = vld [vmem:[#allocation2 + $0x640] ss:$24 sps:$4 sm:$0xff]   ;;  %v3197_v33 = vld [vmem:[#allocation2 + $0x614] ss:$24 sps:$4 sm:$0xff]  }
 0x10f   :  { %2320 = vmatprep.subr.bf16.mxu1 %v3149_v34  ;;  %v3195_v34 = vld [vmem:[#allocation2 + $0x610] ss:$24 sps:$4 sm:$0xff]  }
 0x111   :  { %2288 = vmatpush2.bf16.msra.mxu0 %v3144_v35  ;;  %v3198_v35 = vld [vmem:[#allocation2 + $0x8e0] ss:$24 sps:$4 sm:$0xff]  }
 0x112   :  { %2321 = vmatpush2.bf16.msra.mxu1 %v3147_v36  ;;  %2289 = vmatprep.subr.bf16.mxu0 %v3152_v37  ;;  %v3203_v36 = vld [vmem:[#allocation2 + $0x8b4] ss:$24 sps:$4 sm:$0xff]   ;;  %v3201_v37 = vld [vmem:[#allocation2 + $0x8b0] ss:$24 sps:$4 sm:$0xff]  }
 0x113   :  { %2322 = vmatprep.subr.bf16.mxu1 %v3155_v38  ;;  %v3204_v38 = vld [vmem:[#allocation2 + $0x880] ss:$24 sps:$4 sm:$0xff]  }
 0x115   :  { %2290 = vmatpush2.bf16.msra.mxu0 %v3150_v39  ;;  %v3209_v39 = vld [vmem:[#allocation2 + $0x854] ss:$24 sps:$4 sm:$0xff]  }
 0x116   :  { %2323 = vmatpush2.bf16.msra.mxu1 %v3153_v40  ;;  %2291 = vmatprep.subr.bf16.mxu0 %v3158_v41  ;;  %v3207_v40 = vld [vmem:[#allocation2 + $0x850] ss:$24 sps:$4 sm:$0xff]   ;;  %v3210_v41 = vld [vmem:[#allocation2 + $0x820] ss:$24 sps:$4 sm:$0xff]  }
 0x117   :  { %2324 = vmatprep.subr.bf16.mxu1 %v3161_v43  ;;  %v3215_v43 = vld [vmem:[#allocation2 + $0x7f4] ss:$24 sps:$4 sm:$0xff]  }
 0x119   :  { %2292 = vmatpush2.bf16.msra.mxu0 %v3156_v44  ;;  %v3213_v44 = vld [vmem:[#allocation2 + $0x7f0] ss:$24 sps:$4 sm:$0xff]  }
 0x11a   :  { %2325 = vmatpush2.bf16.msra.mxu1 %v3159_v45  ;;  %2343 = vmatprep.subr.bf16.mxu0 %v3167_v49  ;;  %v3221_v45 = vld [vmem:[#allocation2 + $0x7c4] ss:$24 sps:$4 sm:$0xff]   ;;  %v3225_v49 = vld [vmem:[#allocation2 + $0x790] ss:$24 sps:$4 sm:$0xff]  }
 0x11b   :  { %2326 = vmatprep.subr.bf16.mxu1 %v3164_v48  ;;  %v3227_v48 = vld [vmem:[#allocation2 + $0x794] ss:$24 sps:$4 sm:$0xff]  }
 0x11c   :  { %v1967_v60 = vpop.f32.mrf.mxu0  ;;  %2294 = vmatmul.mubr.bf16.vlgmr.msra.gmra.mxu0 %v3324_v11 }
 0x11d   :  { %v2008_v57 = vpop.f32.mrf.mxu1  ;;  %v1968_v58 = vadd.f32 %v1967_v60, %v347_v51  ;;  %2344 = vmatpush1.bf16.msra.mxu0 %v3165_v53  ;;  %2375 = vmatprep.mubr.bf16.mxu0 %v3332_v22  ;;  %v3183_v22 = vld [vmem:[#allocation2 + $0x6d0] ss:$24 sps:$4 sm:$0xff]  }
 0x11e   :  { %2327 = vmatpush2.bf16.msra.mxu1 %v3162_v52  ;;  %v1969_v62 = vpop.f32.mrf.mxu0  ;;  %2345 = vmatprep.subr.bf16.mxu0 %v3173_v55 }
 0x11f   :  { %v2010_v63 = vpop.f32.mrf.mxu1  ;;  %2328 = vmatprep.subr.bf16.mxu1 %v3170_v54  ;;  %v1970_v3 = vadd.f32 %v1969_v62, %v351_v56  ;;  %v3366_v4 = vadd.f32 %v2008_v57, %v1968_v58 }
 0x120   :  { %v1971_v5 = vpop.f32.mrf.mxu0 }
 0x121   :  { %v2012_v6 = vpop.f32.mrf.mxu1  ;;  %v3369_v11 = vadd.f32 %v2010_v63, %v1970_v3  ;;  %2346 = vmatpush1.bf16.msra.mxu0 %v3171_v61  ;;  %v358_v3 = vsub.s32 3, %v3305_v42 }
 0x122   :  { %2329 = vmatpush2.bf16.msra.mxu1 %v3168_v59  ;;  %v1972_v9 = vpop.f32.mrf.mxu0  ;;  %2347 = vmatprep.subr.bf16.mxu0 %v3179_v2 }
 0x123   :  { %2330 = vmatprep.subr.bf16.mxu1 %v3176_v1  ;;  %v2013_v12 = vpop.f32.mrf.mxu1 }
 0x125   :  { %v3371_v13 = vpop.f32.mrf.mxu1  ;;  %2348 = vmatpush1.bf16.msra.mxu0 %v3177_v8  ;;  %v3278_v8 = vmov 1983009808  }
 0x126   :  { %2331 = vmatpush2.bf16.msra.mxu1 %v3174_v7  ;;  %2349 = vmatprep.subr.bf16.mxu0 %v3185_v0  ;;  %v2434_v9 = vunpack.c.l.s4 %v3278_v8 }
 0x127   :  { %2332 = vmatprep.subr.bf16.mxu1 %v3182_v10  ;;  %v3373_v16 = vpop.f32.mrf.mxu1 }
 0x129   :  { %v2094_v19 = vpop.f32.mrf.mxu1  ;;  %2350 = vmatpush1.bf16.msra.mxu0 %v3183_v22 }
 0x12a   :  { %2333 = vmatpush2.bf16.msra.mxu1 %v3180_v14  ;;  %2351 = vmatprep.subr.bf16.mxu0 %v3188_v15  ;;  %v2435_v14 = vunpack.c.0.s8 %v2434_v9 }
 0x12b   :  { %v2095_v25 = vpop.f32.mrf.mxu1  ;;  %2396 = vmatprep.subr.bf16.mxu1 %v3218_v17 }
 0x12d   :  { %2335 = vmatmul.mubr.bf16.vlgmr.msra.gmra.mxu1 %v3329_v18  ;;  %2352 = vmatpush1.bf16.msra.mxu0 %v3186_v20  ;;  %v3200_v18 = vld [vmem:[#allocation2 + $0x8e4] ss:$24 sps:$4 sm:$0xff]  }
 0x12e   :  { %2397 = vmatpush1.bf16.msra.mxu1 %v3216_v21  ;;  %2353 = vmatprep.subr.bf16.mxu0 %v3191_v24  ;;  %v2438_v21 = vsub.s32 %v2435_v14, %v3305_v42 }
 0x12f   :  { %2398 = vmatprep.subr.bf16.mxu1 %v3224_v26  ;;  %2416 = vmatprep.mubr.bf16.mxu1 %v3277_v28  ;;  %v3206_v28 = vld [vmem:[#allocation2 + $0x884] ss:$24 sps:$4 sm:$0xff]  }
 0x131   :  { %2354 = vmatpush1.bf16.msra.mxu0 %v3189_v27 }
 0x132   :  { %2399 = vmatpush1.bf16.msra.mxu1 %v3222_v29  ;;  %2355 = vmatprep.subr.bf16.mxu0 %v3194_v31 }
 0x135   :  { %2768 = vmatmul.mubr.msk.bf16.vlgmr.msra.gmra.mxu1 %vm1929_vm0, %v3343_v30  ;;  %2356 = vmatpush1.bf16.msra.mxu0 %v3192_v32  ;;  %v3212_v30 = vld [vmem:[#allocation2 + $0x824] ss:$24 sps:$4 sm:$0xff]  }
 0x136   :  { %2357 = vmatprep.subr.bf16.mxu0 %v3197_v33 }
 0x139   :  { %2358 = vmatpush1.bf16.msra.mxu0 %v3195_v34 }
 0x13a   :  { %2359 = vmatprep.subr.bf16.mxu0 %v3200_v18 }
 0x13d   :  { %2360 = vmatpush2.bf16.msra.mxu0 %v3198_v35 }
 0x13e   :  { %2361 = vmatprep.subr.bf16.mxu0 %v3203_v36 }
 0x141   :  { %2362 = vmatpush2.bf16.msra.mxu0 %v3201_v37 }
 0x142   :  { %2363 = vmatprep.subr.bf16.mxu0 %v3206_v28 }
 0x145   :  { %2364 = vmatpush2.bf16.msra.mxu0 %v3204_v38 }
 0x146   :  { %2365 = vmatprep.subr.bf16.mxu0 %v3209_v39 }
 0x149   :  { %2366 = vmatpush2.bf16.msra.mxu0 %v3207_v40 }
 0x14a   :  { %2367 = vmatprep.subr.bf16.mxu0 %v3212_v30 }
 0x14d   :  { %2368 = vmatpush2.bf16.msra.mxu0 %v3210_v41 }
 0x14e   :  { %2369 = vmatprep.subr.bf16.mxu0 %v3215_v43 }
 0x151   :  { %2370 = vmatpush2.bf16.msra.mxu0 %v3213_v44  ;;  %v362_v44 = vsub.s32 4, %v3305_v42 }
 0x152   :  { %2371 = vmatprep.subr.bf16.mxu0 %v3221_v45  ;;  %v366_v45 = vsub.s32 5, %v3305_v42 }
 0x155   :  { %2372 = vmatpush2.bf16.msra.mxu0 %v3219_v46  ;;  %v363_v46 = vrot.slane %v3360_v47, %v362_v44 }
 0x156   :  { %2373 = vmatprep.subr.bf16.mxu0 %v3227_v48  ;;  %v367_v48 = vrot.slane %v3360_v47, %v366_v45 }
 0x159   :  { %2374 = vmatpush2.bf16.msra.mxu0 %v3225_v49 }
 0x15c   :  { %v2049_v50 = vpop.f32.mrf.mxu0  ;;  %2376 = vmatmul.mubr.bf16.vlgmr.msra.gmra.mxu0 %v3335_v23  ;;  %v354_v23 = vsub.s32 2, %v3305_v42 }
 0x15d   :  { %v2050_v51 = vadd.f32 %v2049_v50, %v3366_v4 }
 0x15e   :  { %v2051_v52 = vpop.f32.mrf.mxu0  ;;  %v355_v6 = vrot.slane %v3360_v47, %v354_v23 }
 0x15f   :  { %v2091_v53 = vadd.f32 %v3371_v13, %v2050_v51  ;;  %v2052_v54 = vadd.f32 %v2051_v52, %v3369_v11  ;;  %v359_v11 = vrot.slane %v3360_v47, %v358_v3 }
 0x160   :  { %v2053_v55 = vpop.f32.mrf.mxu0 }
 0x161   :  { %v2093_v56 = vadd.f32 %v3373_v16, %v2052_v54 }
 0x162   :  { %v2054_v60 = vpop.f32.mrf.mxu0 }
 0x163   :  { %v2431_v57 = vcombine.low %v2091_v53, %v2093_v56 }
 0x165   :  { %v2131_v58 = vpop.f32.mrf.mxu1  ;;  %v2439_v31 = vrot.slane %v2431_v57, %v2438_v21 }
 0x166   :  { %v2132_v0 = vadd.f32 %v2131_v58, %v355_v6 }
 0x167   :  { %v2133_v59 = vpop.f32.mrf.mxu1 }
 0x168   :  { %v2134_v12 = vadd.f32 %v2133_v59, %v359_v11 }
 0x169   :  { %v2135_v61 = vpop.f32.mrf.mxu1 }
 0x16b   :  { %v2136_v62 = vpop.f32.mrf.mxu1 }
 0x19c   :  { %v2172_v63 = vpop.f32.mrf.mxu0 }
 0x19d   :  { %v2173_v22 = vadd.f32 %v2172_v63, %v2132_v0 }
 0x19e   :  { %v2174_v1 = vpop.f32.mrf.mxu0 }
 0x19f   :  { %v2175_v15 = vadd.f32 %v2174_v1, %v2134_v12 }
 0x1a0   :  { %v2176_v2 = vpop.f32.mrf.mxu0 }
 0x1a2   :  { %v2177_v4 = vpop.f32.mrf.mxu0 }
 0x1a5   :  { %v2213_v5 = vpop.f32.mrf.mxu1 }
 0x1a6   :  { %v2214_v17 = vadd.f32 %v2213_v5, %v2173_v22 }
 0x1a7   :  { %v2215_v7 = vpop.f32.mrf.mxu1 }
 0x1a8   :  { %v2216_v19 = vadd.f32 %v2215_v7, %v2175_v15 }
 0x1a9   :  { %v2217_v10 = vpop.f32.mrf.mxu1 }
 0x1ab   :  { %v2218_v13 = vpop.f32.mrf.mxu1 }
 0x1ad   :  { %v2254_v16 = vpop.f32.mrf.mxu1 }
 0x1ae   :  { %v2255_v24 = vadd.f32 %v2254_v16, %v2214_v17 }
 0x1af   :  { %v2256_v20 = vpop.f32.mrf.mxu1 }
 0x1b0   :  { %v2257_v25 = vadd.f32 %v2256_v20, %v2216_v19 }
 0x1b1   :  { %v2258_v26 = vpop.f32.mrf.mxu1 }
 0x1b2   :  { %v2432_v27 = vcombine.low %v2255_v24, %v2257_v25 }
 0x1b3   :  { %v2259_v29 = vpop.f32.mrf.mxu1 }
 0x1b4   :  { %v2446_v32 = vrot.slane %v2432_v27, %v2438_v21 }
 0x1b6   :  { %v2447_v33 = vcombine.low %v2439_v31, %v2446_v32 }
 0x1b8   :  { %2458 = vst [vmem:[%s3402_s3] sm:$0xff] %v2447_v33 }
 0x1dc   :  { %v2295_v34 = vpop.f32.mrf.mxu0 }
 0x1dd   :  { %v2296_v49 = vadd.f32 %v2295_v34, %v363_v46 }
 0x1de   :  { %v2297_v18 = vpop.f32.mrf.mxu0 }
 0x1df   :  { %v2298_v50 = vadd.f32 %v2297_v18, %v367_v48 }
 0x1e0   :  { %v2299_v35 = vpop.f32.mrf.mxu0 }
 0x1e2   :  { %v2300_v36 = vpop.f32.mrf.mxu0 }
 0x1ed   :  { %v2336_v37 = vpop.f32.mrf.mxu1 }
 0x1ee   :  { %v2337_v51 = vadd.f32 %v2336_v37, %v2296_v49 }
 0x1ef   :  { %v2338_v28 = vpop.f32.mrf.mxu1 }
 0x1f0   :  { %v2339_v53 = vadd.f32 %v2338_v28, %v2298_v50 }
 0x1f1   :  { %v2340_v38 = vpop.f32.mrf.mxu1 }
 0x1f3   :  { %v2341_v39 = vpop.f32.mrf.mxu1 }
 0x1f5   :  { %v2418_v40 = vpop.f32.mrf.mxu1 }
 0x1f7   :  { %v2420_v30 = vpop.f32.mrf.mxu1 }
 0x1f9   :  { %v2422_v41 = vpop.f32.mrf.mxu1 }
 0x1fb   :  { %v2423_v43 = vpop.f32.mrf.mxu1 }
 0x21c   :  { %v2377_v52 = vpop.f32.mrf.mxu0 }
 0x21d   :  { %v2378_v54 = vadd.f32 %v2377_v52, %v2337_v51 }
 0x21e   :  { %v2379_v55 = vpop.f32.mrf.mxu0 }
 0x21f   :  { %v2380_v56 = vadd.f32 %v2379_v55, %v2339_v53  ;;  %v2419_v57 = vadd.f32 %v2418_v40, %v2378_v54 }
 0x220   :  { %v2381_v60 = vpop.f32.mrf.mxu0 }
 0x221   :  { %v2421_v58 = vadd.f32 %v2420_v30, %v2380_v56 }
 0x222   :  { %v2382_v59 = vpop.f32.mrf.mxu0 }
 0x223   :  { %v2448_v61 = vcombine.low %v2419_v57, %v2421_v58 }
 0x225   :  { %2769 = vst.sshfl [vmem:[%s3402_s3 + $0x8] sm:$0x33 pattern:$0x76325410] %v2448_v61 }
 0x226   :  { %2464 = vsyncpa [#allocation3], 1 }
 0x227   :  { %2465 = vsyncpa [#allocation5], 1 }

</bundles_post_ra>
